<compile_context>
chip_gen: v7x
topology: tpu7x:2x2x1
jax: 0.10.0
libtpu: 0.0.40
codegen_flags: <defaults>
</compile_context>

<pallas_src>
import jax
import jax.numpy as jnp
from jax.experimental import pallas as pl
from jax.experimental.pallas import tpu as pltpu

EPS = 1e-5  # PyTorch LayerNorm default eps
LANE = 128

# Row indices inside the packed 1-D parameter array.
_R_FN_G, _R_FN_B = 0, 1
_R_B1, _R_LN1_G, _R_LN1_B = 2, 3, 4
_R_BH, _R_LN2_G, _R_LN2_B = 5, 6, 7
_R_BIR, _R_BIZ, _R_BIN = 8, 9, 10
_R_BHR, _R_BHZ, _R_BHN = 11, 12, 13
_R_LN3_G, _R_LN3_B = 14, 15
_R_WV, _R_BV = 16, 17
_NUM_VEC_ROWS = 18


def _round_up(x, m):
    return ((x + m - 1) // m) * m


def r_critic_kernel(obs_ref, h_ref, mask_ref,
                    vec_ref,            # [18, VW]  packed 1-D params
                    w1_ref,             # [OBS, H]
                    wh_ref,             # [H, H]
                    wih_ref,            # [3, H, H] (gate order r, z, n)
                    whh_ref,            # [3, H, H]
                    out_ref):           # [TB, OUT_W] packed (h_new | v | 0-pad)
    OBS = obs_ref.shape[-1]
    H = h_ref.shape[-1]
    TB = obs_ref.shape[0]
    OUT_W = out_ref.shape[-1]

    def vec(row, width):
        return vec_ref[row:row + 1, :width]          # [1, width], lane-aligned

    def layernorm(x, g_row, b_row, width):
        mu = jnp.mean(x, axis=-1, keepdims=True)
        ex2 = jnp.mean(x * x, axis=-1, keepdims=True)
        var = ex2 - mu * mu
        return (x - mu) * jax.lax.rsqrt(var + EPS) * vec(g_row, width) + vec(b_row, width)

    # --- MLPBase: feature LayerNorm ---
    x = layernorm(obs_ref[...], _R_FN_G, _R_FN_B, OBS)

    # --- MLPLayer.fc1: Linear -> ReLU -> LayerNorm ---
    x = jnp.dot(x, w1_ref[...], preferred_element_type=jnp.float32) + vec(_R_B1, H)
    x = jnp.maximum(x, 0.0)
    x = layernorm(x, _R_LN1_G, _R_LN1_B, H)

    # --- MLPLayer.fc2[0]: Linear -> ReLU -> LayerNorm  (layer_N = 1) ---
    x = jnp.dot(x, wh_ref[...], preferred_element_type=jnp.float32) + vec(_R_BH, H)
    x = jnp.maximum(x, 0.0)
    x = layernorm(x, _R_LN2_G, _R_LN2_B, H)

    # --- RNNLayer: masked single-step GRU cell (per-gate dots, no lane slicing) ---
    h_prev = h_ref[...] * mask_ref[...]
    i_r = jnp.dot(x, wih_ref[0], preferred_element_type=jnp.float32) + vec(_R_BIR, H)
    i_z = jnp.dot(x, wih_ref[1], preferred_element_type=jnp.float32) + vec(_R_BIZ, H)
    i_n = jnp.dot(x, wih_ref[2], preferred_element_type=jnp.float32) + vec(_R_BIN, H)
    h_r = jnp.dot(h_prev, whh_ref[0], preferred_element_type=jnp.float32) + vec(_R_BHR, H)
    h_z = jnp.dot(h_prev, whh_ref[1], preferred_element_type=jnp.float32) + vec(_R_BHZ, H)
    h_n = jnp.dot(h_prev, whh_ref[2], preferred_element_type=jnp.float32) + vec(_R_BHN, H)
    r = jax.nn.sigmoid(i_r + h_r)
    z = jax.nn.sigmoid(i_z + h_z)
    n = jnp.tanh(i_n + r * h_n)
    h_new = (1.0 - z) * n + z * h_prev

    # --- RNNLayer.norm + v_out (Linear(H, 1) as VPU multiply + lane reduce) ---
    feat = layernorm(h_new, _R_LN3_G, _R_LN3_B, H)
    v = jnp.sum(feat * vec(_R_WV, H), axis=-1, keepdims=True) + vec_ref[_R_BV:_R_BV + 1, 0:1]

    # --- single lane-dense store: [h_new | v | zero pad] ---
    pad = OUT_W - H - 1
    pieces = [h_new, v]
    if pad > 0:
        pieces.append(jnp.zeros((TB, pad), jnp.float32))
    out_ref[...] = jnp.concatenate(pieces, axis=-1)


def r_critic_forward(share_obs, rnn_states, masks, params, max_block_b=256):
    B, OBS = share_obs.shape
    _, N, H = rnn_states.shape
    assert N == 1, "kernel implements recurrent_N = 1"
    vec, w1, wh, wih_s, whh_s = (params["vec"], params["w1"], params["wh"],
                                 params["wih"], params["whh"])
    OUT_W = _round_up(H + 1, LANE)

    # Batch tiling (TB multiple of 8; pad B so the grid divides evenly).
    TB = min(_round_up(B, 8), max_block_b)
    Bp = _round_up(B, TB)

    def pad_b(a):
        return jnp.pad(a, ((0, Bp - B), (0, 0))) if Bp != B else a

    obs = pad_b(share_obs.astype(jnp.float32))
    h = pad_b(rnn_states.reshape(B, H).astype(jnp.float32))
    m = pad_b(masks.astype(jnp.float32))

    nb = Bp // TB

    data_spec = lambda F: pl.BlockSpec((TB, F), lambda i: (i, 0))
    w2_spec = lambda a: pl.BlockSpec(a.shape, lambda i: (0, 0))
    w3_spec = lambda a: pl.BlockSpec(a.shape, lambda i: (0, 0, 0))

    out = pl.pallas_call(
        r_critic_kernel,
        out_shape=jax.ShapeDtypeStruct((Bp, OUT_W), jnp.float32),
        grid=(nb,),
        in_specs=[data_spec(OBS), data_spec(H), data_spec(1),
                  w2_spec(vec), w2_spec(w1), w2_spec(wh),
                  w3_spec(wih_s), w3_spec(whh_s)],
        out_specs=pl.BlockSpec((TB, OUT_W), lambda i: (i, 0)),
        compiler_params=pltpu.CompilerParams(dimension_semantics=("parallel",)),
    )(obs, h, m, vec, w1, wh, wih_s, whh_s)

    h_new = out[:B, :H]
    values = out[:B, H:H + 1]
    return values, h_new.reshape(B, N, H)


def make_params(key, obs_dim, hidden):
    """Deterministic synthetic parameters (shapes match the PyTorch module),
    pre-packed into the kernel's layout."""
    ks = jax.random.split(key, 10)
    f32 = jnp.float32
    s = 0.1

    def rnd(k, shape):
        return (s * jax.random.normal(k, shape)).astype(f32)

    VW = _round_up(max(obs_dim, hidden), LANE)

    def row(v):
        v = jnp.asarray(v, f32).reshape(-1)
        return jnp.pad(v, (0, VW - v.shape[0]))

    w1 = rnd(ks[0], (obs_dim, hidden)); b1 = rnd(ks[1], (hidden,))
    wh = rnd(ks[2], (hidden, hidden));  bh = rnd(ks[3], (hidden,))
    wih = rnd(ks[4], (hidden, 3 * hidden)); bih = rnd(ks[5], (3 * hidden,))
    whh = rnd(ks[6], (hidden, 3 * hidden)); bhh = rnd(ks[7], (3 * hidden,))
    wv = rnd(ks[8], (hidden,)); bv = jnp.zeros((1,), f32)

    # Per-gate weight stacks (gate order r, z, n), each [in, H].
    wih_s = jnp.stack([wih[:, g * hidden:(g + 1) * hidden] for g in range(3)], axis=0)
    whh_s = jnp.stack([whh[:, g * hidden:(g + 1) * hidden] for g in range(3)], axis=0)

    vec = jnp.stack([
        row(jnp.ones((obs_dim,))),            # 0  feature_norm gain
        row(jnp.zeros((obs_dim,))),           # 1  feature_norm bias
        row(b1),                              # 2  fc1 bias
        row(jnp.ones((hidden,))),             # 3  ln1 gain
        row(jnp.zeros((hidden,))),            # 4  ln1 bias
        row(bh),                              # 5  fc2 bias
        row(jnp.ones((hidden,))),             # 6  ln2 gain
        row(jnp.zeros((hidden,))),            # 7  ln2 bias
        row(bih[0 * hidden:1 * hidden]),      # 8  b_ir
        row(bih[1 * hidden:2 * hidden]),      # 9  b_iz
        row(bih[2 * hidden:3 * hidden]),      # 10 b_in
        row(bhh[0 * hidden:1 * hidden]),      # 11 b_hr
        row(bhh[1 * hidden:2 * hidden]),      # 12 b_hz
        row(bhh[2 * hidden:3 * hidden]),      # 13 b_hn
        row(jnp.ones((hidden,))),             # 14 rnn norm gain
        row(jnp.zeros((hidden,))),            # 15 rnn norm bias
        row(wv),                              # 16 v_out weight row
        row(bv),                              # 17 v_out bias (lane 0)
    ], axis=0)                                # [18, VW]
    assert vec.shape[0] == _NUM_VEC_ROWS
    return dict(vec=vec, w1=w1, wh=wh, wih=wih_s, whh=whh_s)


def reference_forward(share_obs, rnn_states, masks, params):
    """Pure-JAX mirror of the PyTorch forward, for a sanity check."""
    vec, w1, wh, wih_s, whh_s = (params["vec"], params["w1"], params["wh"],
                                 params["wih"], params["whh"])
    OBS = share_obs.shape[-1]
    H = w1.shape[1]
    g = lambda r, w: vec[r, :w]

    def ln(x, gr, br, w):
        mu = jnp.mean(x, axis=-1, keepdims=True)
        var = jnp.mean((x - mu) ** 2, axis=-1, keepdims=True)
        return (x - mu) * jax.lax.rsqrt(var + EPS) * g(gr, w) + g(br, w)

    x = ln(share_obs, _R_FN_G, _R_FN_B, OBS)
    x = ln(jnp.maximum(x @ w1 + g(_R_B1, H), 0.0), _R_LN1_G, _R_LN1_B, H)
    x = ln(jnp.maximum(x @ wh + g(_R_BH, H), 0.0), _R_LN2_G, _R_LN2_B, H)
    h_prev = rnn_states[:, 0, :] * masks
    i_r = x @ wih_s[0] + g(_R_BIR, H)
    i_z = x @ wih_s[1] + g(_R_BIZ, H)
    i_n = x @ wih_s[2] + g(_R_BIN, H)
    h_r = h_prev @ whh_s[0] + g(_R_BHR, H)
    h_z = h_prev @ whh_s[1] + g(_R_BHZ, H)
    h_n = h_prev @ whh_s[2] + g(_R_BHN, H)
    r = jax.nn.sigmoid(i_r + h_r)
    z = jax.nn.sigmoid(i_z + h_z)
    n = jnp.tanh(i_n + r * h_n)
    h_new = (1.0 - z) * n + z * h_prev
    feat = ln(h_new, _R_LN3_G, _R_LN3_B, H)
    v = jnp.sum(feat * g(_R_WV, H), axis=-1, keepdims=True) + vec[_R_BV, 0]
    return v, h_new[:, None, :]


if __name__ == "__main__":
    B, OBS, H, N = 8, 24, 32, 1

    key = jax.random.PRNGKey(0)
    k_obs, k_h, k_p = jax.random.split(key, 3)
    share_obs = jax.random.normal(k_obs, (B, OBS), dtype=jnp.float32)
    rnn_states = jax.random.normal(k_h, (B, N, H), dtype=jnp.float32)
    masks = jnp.ones((B, 1), dtype=jnp.float32).at[0, 0].set(0.0)  # one reset env

    params = make_params(k_p, OBS, H)

    values, rnn_out = r_critic_forward(share_obs, rnn_states, masks, params)
    jax.block_until_ready((values, rnn_out))

    v_ref, h_ref_out = reference_forward(share_obs, rnn_states, masks, params)
    assert values.shape == (B, 1) and rnn_out.shape == (B, N, H)
    assert jnp.allclose(values, v_ref, atol=1e-3, rtol=1e-3)
    assert jnp.allclose(rnn_out, h_ref_out, atol=1e-3, rtol=1e-3)

    print("KERNEL_OK")
</pallas_src>

<mosaic_0001>
module attributes {stable_mosaic.version = 11 : i64} {
  func.func @r_critic_kernel(%arg0: i32, %arg1: memref<8x24xf32, #tpu.memory_space<vmem>>, %arg2: memref<8x32xf32, #tpu.memory_space<vmem>>, %arg3: memref<8x1xf32, #tpu.memory_space<vmem>>, %arg4: memref<18x128xf32, #tpu.memory_space<vmem>>, %arg5: memref<24x32xf32, #tpu.memory_space<vmem>>, %arg6: memref<32x32xf32, #tpu.memory_space<vmem>>, %arg7: memref<3x32x32xf32, #tpu.memory_space<vmem>>, %arg8: memref<3x32x32xf32, #tpu.memory_space<vmem>>, %arg9: memref<8x128xf32, #tpu.memory_space<vmem>>) attributes {dimension_semantics = [#tpu.dimension_semantics<parallel>], iteration_bounds = array<i64: 1>, scalar_prefetch = 0 : i64, scratch_operands = 0 : i64, tpu.core_type = #tpu.core_type<tc>, window_params = [{transform_indices = @transform_0, window_bounds = array<i64: 8, 24>}, {transform_indices = @transform_1, window_bounds = array<i64: 8, 32>}, {transform_indices = @transform_2, window_bounds = array<i64: 8, 1>}, {pipeline_mode = #tpu.pipeline_mode<synchronous>, transform_indices = @transform_3, window_bounds = array<i64: 18, 128>}, {pipeline_mode = #tpu.pipeline_mode<synchronous>, transform_indices = @transform_4, window_bounds = array<i64: 24, 32>}, {pipeline_mode = #tpu.pipeline_mode<synchronous>, transform_indices = @transform_5, window_bounds = array<i64: 32, 32>}, {pipeline_mode = #tpu.pipeline_mode<synchronous>, transform_indices = @transform_6, window_bounds = array<i64: 3, 32, 32>}, {pipeline_mode = #tpu.pipeline_mode<synchronous>, transform_indices = @transform_7, window_bounds = array<i64: 3, 32, 32>}, {transform_indices = @transform_8, window_bounds = array<i64: 8, 128>}]} {
    %c0 = arith.constant 0 : index
    %c0_0 = arith.constant 0 : index
    %0 = vector.load %arg1[%c0, %c0_0] : memref<8x24xf32, #tpu.memory_space<vmem>>, vector<8x24xf32>
    %cst = arith.constant dense<0.000000e+00> : vector<8xf32>
    %1 = vector.multi_reduction <add>, %0, %cst [1] : vector<8x24xf32> to vector<8xf32>
    %2 = vector.shape_cast %1 : vector<8xf32> to vector<8x1xf32>
    %cst_1 = arith.constant 2.400000e+01 : f32
    %3 = vector.broadcast %cst_1 : f32 to vector<8x1xf32>
    %4 = arith.divf %2, %3 : vector<8x1xf32>
    %5 = arith.mulf %0, %0 : vector<8x24xf32>
    %cst_2 = arith.constant dense<0.000000e+00> : vector<8xf32>
    %6 = vector.multi_reduction <add>, %5, %cst_2 [1] : vector<8x24xf32> to vector<8xf32>
    %7 = vector.shape_cast %6 : vector<8xf32> to vector<8x1xf32>
    %cst_3 = arith.constant 2.400000e+01 : f32
    %8 = vector.broadcast %cst_3 : f32 to vector<8x1xf32>
    %9 = arith.divf %7, %8 : vector<8x1xf32>
    %10 = arith.mulf %4, %4 : vector<8x1xf32>
    %11 = arith.subf %9, %10 : vector<8x1xf32>
    %12 = vector.broadcast %4 : vector<8x1xf32> to vector<8x24xf32>
    %13 = arith.subf %0, %12 : vector<8x24xf32>
    %cst_4 = arith.constant 9.99999974E-6 : f32
    %14 = vector.broadcast %cst_4 : f32 to vector<8x1xf32>
    %15 = arith.addf %11, %14 : vector<8x1xf32>
    %16 = math.rsqrt %15 : vector<8x1xf32>
    %17 = vector.broadcast %16 : vector<8x1xf32> to vector<8x24xf32>
    %18 = arith.mulf %13, %17 : vector<8x24xf32>
    %c0_5 = arith.constant 0 : index
    %c0_6 = arith.constant 0 : index
    %19 = vector.load %arg4[%c0_5, %c0_6] : memref<18x128xf32, #tpu.memory_space<vmem>>, vector<1x24xf32>
    %20 = vector.broadcast %19 : vector<1x24xf32> to vector<8x24xf32>
    %21 = arith.mulf %18, %20 : vector<8x24xf32>
    %c1 = arith.constant 1 : index
    %c0_7 = arith.constant 0 : index
    %22 = vector.load %arg4[%c1, %c0_7] : memref<18x128xf32, #tpu.memory_space<vmem>>, vector<1x24xf32>
    %23 = vector.broadcast %22 : vector<1x24xf32> to vector<8x24xf32>
    %24 = arith.addf %21, %23 : vector<8x24xf32>
    %c0_8 = arith.constant 0 : index
    %c0_9 = arith.constant 0 : index
    %25 = vector.load %arg5[%c0_8, %c0_9] : memref<24x32xf32, #tpu.memory_space<vmem>>, vector<24x32xf32>
    %cst_10 = arith.constant dense<0.000000e+00> : vector<8x32xf32>
    %26 = tpu.matmul %24, %25, %cst_10 {dimension_numbers = #tpu.dot_dimension_numbers<[1], [0], [0], [1], [0, 0, 1, 1], [], []>} : vector<8x24xf32>, vector<24x32xf32>, vector<8x32xf32> -> vector<8x32xf32>
    %c2 = arith.constant 2 : index
    %c0_11 = arith.constant 0 : index
    %27 = vector.load %arg4[%c2, %c0_11] : memref<18x128xf32, #tpu.memory_space<vmem>>, vector<1x32xf32>
    %28 = vector.broadcast %27 : vector<1x32xf32> to vector<8x32xf32>
    %29 = arith.addf %26, %28 : vector<8x32xf32>
    %cst_12 = arith.constant 0.000000e+00 : f32
    %30 = vector.broadcast %cst_12 : f32 to vector<8x32xf32>
    %31 = arith.maximumf %29, %30 : vector<8x32xf32>
    %cst_13 = arith.constant dense<0.000000e+00> : vector<8xf32>
    %32 = vector.multi_reduction <add>, %31, %cst_13 [1] : vector<8x32xf32> to vector<8xf32>
    %33 = vector.shape_cast %32 : vector<8xf32> to vector<8x1xf32>
    %cst_14 = arith.constant 3.200000e+01 : f32
    %34 = vector.broadcast %cst_14 : f32 to vector<8x1xf32>
    %35 = arith.divf %33, %34 : vector<8x1xf32>
    %36 = arith.mulf %31, %31 : vector<8x32xf32>
    %cst_15 = arith.constant dense<0.000000e+00> : vector<8xf32>
    %37 = vector.multi_reduction <add>, %36, %cst_15 [1] : vector<8x32xf32> to vector<8xf32>
    %38 = vector.shape_cast %37 : vector<8xf32> to vector<8x1xf32>
    %cst_16 = arith.constant 3.200000e+01 : f32
    %39 = vector.broadcast %cst_16 : f32 to vector<8x1xf32>
    %40 = arith.divf %38, %39 : vector<8x1xf32>
    %41 = arith.mulf %35, %35 : vector<8x1xf32>
    %42 = arith.subf %40, %41 : vector<8x1xf32>
    %43 = vector.broadcast %35 : vector<8x1xf32> to vector<8x32xf32>
    %44 = arith.subf %31, %43 : vector<8x32xf32>
    %cst_17 = arith.constant 9.99999974E-6 : f32
    %45 = vector.broadcast %cst_17 : f32 to vector<8x1xf32>
    %46 = arith.addf %42, %45 : vector<8x1xf32>
    %47 = math.rsqrt %46 : vector<8x1xf32>
    %48 = vector.broadcast %47 : vector<8x1xf32> to vector<8x32xf32>
    %49 = arith.mulf %44, %48 : vector<8x32xf32>
    %c3 = arith.constant 3 : index
    %c0_18 = arith.constant 0 : index
    %50 = vector.load %arg4[%c3, %c0_18] : memref<18x128xf32, #tpu.memory_space<vmem>>, vector<1x32xf32>
    %51 = vector.broadcast %50 : vector<1x32xf32> to vector<8x32xf32>
    %52 = arith.mulf %49, %51 : vector<8x32xf32>
    %c4 = arith.constant 4 : index
    %c0_19 = arith.constant 0 : index
    %53 = vector.load %arg4[%c4, %c0_19] : memref<18x128xf32, #tpu.memory_space<vmem>>, vector<1x32xf32>
    %54 = vector.broadcast %53 : vector<1x32xf32> to vector<8x32xf32>
    %55 = arith.addf %52, %54 : vector<8x32xf32>
    %c0_20 = arith.constant 0 : index
    %c0_21 = arith.constant 0 : index
    %56 = vector.load %arg6[%c0_20, %c0_21] : memref<32x32xf32, #tpu.memory_space<vmem>>, vector<32x32xf32>
    %cst_22 = arith.constant dense<0.000000e+00> : vector<8x32xf32>
    %57 = tpu.matmul %55, %56, %cst_22 {dimension_numbers = #tpu.dot_dimension_numbers<[1], [0], [0], [1], [0, 0, 1, 1], [], []>} : vector<8x32xf32>, vector<32x32xf32>, vector<8x32xf32> -> vector<8x32xf32>
    %c5 = arith.constant 5 : index
    %c0_23 = arith.constant 0 : index
    %58 = vector.load %arg4[%c5, %c0_23] : memref<18x128xf32, #tpu.memory_space<vmem>>, vector<1x32xf32>
    %59 = vector.broadcast %58 : vector<1x32xf32> to vector<8x32xf32>
    %60 = arith.addf %57, %59 : vector<8x32xf32>
    %cst_24 = arith.constant 0.000000e+00 : f32
    %61 = vector.broadcast %cst_24 : f32 to vector<8x32xf32>
    %62 = arith.maximumf %60, %61 : vector<8x32xf32>
    %cst_25 = arith.constant dense<0.000000e+00> : vector<8xf32>
    %63 = vector.multi_reduction <add>, %62, %cst_25 [1] : vector<8x32xf32> to vector<8xf32>
    %64 = vector.shape_cast %63 : vector<8xf32> to vector<8x1xf32>
    %cst_26 = arith.constant 3.200000e+01 : f32
    %65 = vector.broadcast %cst_26 : f32 to vector<8x1xf32>
    %66 = arith.divf %64, %65 : vector<8x1xf32>
    %67 = arith.mulf %62, %62 : vector<8x32xf32>
    %cst_27 = arith.constant dense<0.000000e+00> : vector<8xf32>
    %68 = vector.multi_reduction <add>, %67, %cst_27 [1] : vector<8x32xf32> to vector<8xf32>
    %69 = vector.shape_cast %68 : vector<8xf32> to vector<8x1xf32>
    %cst_28 = arith.constant 3.200000e+01 : f32
    %70 = vector.broadcast %cst_28 : f32 to vector<8x1xf32>
    %71 = arith.divf %69, %70 : vector<8x1xf32>
    %72 = arith.mulf %66, %66 : vector<8x1xf32>
    %73 = arith.subf %71, %72 : vector<8x1xf32>
    %74 = vector.broadcast %66 : vector<8x1xf32> to vector<8x32xf32>
    %75 = arith.subf %62, %74 : vector<8x32xf32>
    %cst_29 = arith.constant 9.99999974E-6 : f32
    %76 = vector.broadcast %cst_29 : f32 to vector<8x1xf32>
    %77 = arith.addf %73, %76 : vector<8x1xf32>
    %78 = math.rsqrt %77 : vector<8x1xf32>
    %79 = vector.broadcast %78 : vector<8x1xf32> to vector<8x32xf32>
    %80 = arith.mulf %75, %79 : vector<8x32xf32>
    %c6 = arith.constant 6 : index
    %c0_30 = arith.constant 0 : index
    %81 = vector.load %arg4[%c6, %c0_30] : memref<18x128xf32, #tpu.memory_space<vmem>>, vector<1x32xf32>
    %82 = vector.broadcast %81 : vector<1x32xf32> to vector<8x32xf32>
    %83 = arith.mulf %80, %82 : vector<8x32xf32>
    %c7 = arith.constant 7 : index
    %c0_31 = arith.constant 0 : index
    %84 = vector.load %arg4[%c7, %c0_31] : memref<18x128xf32, #tpu.memory_space<vmem>>, vector<1x32xf32>
    %85 = vector.broadcast %84 : vector<1x32xf32> to vector<8x32xf32>
    %86 = arith.addf %83, %85 : vector<8x32xf32>
    %c0_32 = arith.constant 0 : index
    %c0_33 = arith.constant 0 : index
    %87 = vector.load %arg2[%c0_32, %c0_33] : memref<8x32xf32, #tpu.memory_space<vmem>>, vector<8x32xf32>
    %c0_34 = arith.constant 0 : index
    %c0_35 = arith.constant 0 : index
    %88 = vector.load %arg3[%c0_34, %c0_35] : memref<8x1xf32, #tpu.memory_space<vmem>>, vector<8x1xf32>
    %89 = vector.broadcast %88 : vector<8x1xf32> to vector<8x32xf32>
    %90 = arith.mulf %87, %89 : vector<8x32xf32>
    %c0_36 = arith.constant 0 : index
    %c0_37 = arith.constant 0 : index
    %c0_38 = arith.constant 0 : index
    %91 = vector.load %arg7[%c0_36, %c0_37, %c0_38] : memref<3x32x32xf32, #tpu.memory_space<vmem>>, vector<1x32x32xf32>
    %92 = vector.shape_cast %91 : vector<1x32x32xf32> to vector<32x32xf32>
    %cst_39 = arith.constant dense<0.000000e+00> : vector<8x32xf32>
    %93 = tpu.matmul %86, %92, %cst_39 {dimension_numbers = #tpu.dot_dimension_numbers<[1], [0], [0], [1], [0, 0, 1, 1], [], []>} : vector<8x32xf32>, vector<32x32xf32>, vector<8x32xf32> -> vector<8x32xf32>
    %c8 = arith.constant 8 : index
    %c0_40 = arith.constant 0 : index
    %94 = vector.load %arg4[%c8, %c0_40] : memref<18x128xf32, #tpu.memory_space<vmem>>, vector<1x32xf32>
    %95 = vector.broadcast %94 : vector<1x32xf32> to vector<8x32xf32>
    %96 = arith.addf %93, %95 : vector<8x32xf32>
    %c1_41 = arith.constant 1 : index
    %c0_42 = arith.constant 0 : index
    %c0_43 = arith.constant 0 : index
    %97 = vector.load %arg7[%c1_41, %c0_42, %c0_43] : memref<3x32x32xf32, #tpu.memory_space<vmem>>, vector<1x32x32xf32>
    %98 = vector.shape_cast %97 : vector<1x32x32xf32> to vector<32x32xf32>
    %cst_44 = arith.constant dense<0.000000e+00> : vector<8x32xf32>
    %99 = tpu.matmul %86, %98, %cst_44 {dimension_numbers = #tpu.dot_dimension_numbers<[1], [0], [0], [1], [0, 0, 1, 1], [], []>} : vector<8x32xf32>, vector<32x32xf32>, vector<8x32xf32> -> vector<8x32xf32>
    %c9 = arith.constant 9 : index
    %c0_45 = arith.constant 0 : index
    %100 = vector.load %arg4[%c9, %c0_45] : memref<18x128xf32, #tpu.memory_space<vmem>>, vector<1x32xf32>
    %101 = vector.broadcast %100 : vector<1x32xf32> to vector<8x32xf32>
    %102 = arith.addf %99, %101 : vector<8x32xf32>
    %c2_46 = arith.constant 2 : index
    %c0_47 = arith.constant 0 : index
    %c0_48 = arith.constant 0 : index
    %103 = vector.load %arg7[%c2_46, %c0_47, %c0_48] : memref<3x32x32xf32, #tpu.memory_space<vmem>>, vector<1x32x32xf32>
    %104 = vector.shape_cast %103 : vector<1x32x32xf32> to vector<32x32xf32>
    %cst_49 = arith.constant dense<0.000000e+00> : vector<8x32xf32>
    %105 = tpu.matmul %86, %104, %cst_49 {dimension_numbers = #tpu.dot_dimension_numbers<[1], [0], [0], [1], [0, 0, 1, 1], [], []>} : vector<8x32xf32>, vector<32x32xf32>, vector<8x32xf32> -> vector<8x32xf32>
    %c10 = arith.constant 10 : index
    %c0_50 = arith.constant 0 : index
    %106 = vector.load %arg4[%c10, %c0_50] : memref<18x128xf32, #tpu.memory_space<vmem>>, vector<1x32xf32>
    %107 = vector.broadcast %106 : vector<1x32xf32> to vector<8x32xf32>
    %108 = arith.addf %105, %107 : vector<8x32xf32>
    %c0_51 = arith.constant 0 : index
    %c0_52 = arith.constant 0 : index
    %c0_53 = arith.constant 0 : index
    %109 = vector.load %arg8[%c0_51, %c0_52, %c0_53] : memref<3x32x32xf32, #tpu.memory_space<vmem>>, vector<1x32x32xf32>
    %110 = vector.shape_cast %109 : vector<1x32x32xf32> to vector<32x32xf32>
    %cst_54 = arith.constant dense<0.000000e+00> : vector<8x32xf32>
    %111 = tpu.matmul %90, %110, %cst_54 {dimension_numbers = #tpu.dot_dimension_numbers<[1], [0], [0], [1], [0, 0, 1, 1], [], []>} : vector<8x32xf32>, vector<32x32xf32>, vector<8x32xf32> -> vector<8x32xf32>
    %c11 = arith.constant 11 : index
    %c0_55 = arith.constant 0 : index
    %112 = vector.load %arg4[%c11, %c0_55] : memref<18x128xf32, #tpu.memory_space<vmem>>, vector<1x32xf32>
    %113 = vector.broadcast %112 : vector<1x32xf32> to vector<8x32xf32>
    %114 = arith.addf %111, %113 : vector<8x32xf32>
    %c1_56 = arith.constant 1 : index
    %c0_57 = arith.constant 0 : index
    %c0_58 = arith.constant 0 : index
    %115 = vector.load %arg8[%c1_56, %c0_57, %c0_58] : memref<3x32x32xf32, #tpu.memory_space<vmem>>, vector<1x32x32xf32>
    %116 = vector.shape_cast %115 : vector<1x32x32xf32> to vector<32x32xf32>
    %cst_59 = arith.constant dense<0.000000e+00> : vector<8x32xf32>
    %117 = tpu.matmul %90, %116, %cst_59 {dimension_numbers = #tpu.dot_dimension_numbers<[1], [0], [0], [1], [0, 0, 1, 1], [], []>} : vector<8x32xf32>, vector<32x32xf32>, vector<8x32xf32> -> vector<8x32xf32>
    %c12 = arith.constant 12 : index
    %c0_60 = arith.constant 0 : index
    %118 = vector.load %arg4[%c12, %c0_60] : memref<18x128xf32, #tpu.memory_space<vmem>>, vector<1x32xf32>
    %119 = vector.broadcast %118 : vector<1x32xf32> to vector<8x32xf32>
    %120 = arith.addf %117, %119 : vector<8x32xf32>
    %c2_61 = arith.constant 2 : index
    %c0_62 = arith.constant 0 : index
    %c0_63 = arith.constant 0 : index
    %121 = vector.load %arg8[%c2_61, %c0_62, %c0_63] : memref<3x32x32xf32, #tpu.memory_space<vmem>>, vector<1x32x32xf32>
    %122 = vector.shape_cast %121 : vector<1x32x32xf32> to vector<32x32xf32>
    %cst_64 = arith.constant dense<0.000000e+00> : vector<8x32xf32>
    %123 = tpu.matmul %90, %122, %cst_64 {dimension_numbers = #tpu.dot_dimension_numbers<[1], [0], [0], [1], [0, 0, 1, 1], [], []>} : vector<8x32xf32>, vector<32x32xf32>, vector<8x32xf32> -> vector<8x32xf32>
    %c13 = arith.constant 13 : index
    %c0_65 = arith.constant 0 : index
    %124 = vector.load %arg4[%c13, %c0_65] : memref<18x128xf32, #tpu.memory_space<vmem>>, vector<1x32xf32>
    %125 = vector.broadcast %124 : vector<1x32xf32> to vector<8x32xf32>
    %126 = arith.addf %123, %125 : vector<8x32xf32>
    %127 = arith.addf %96, %114 : vector<8x32xf32>
    %128 = arith.negf %127 : vector<8x32xf32>
    %129 = math.exp %128 : vector<8x32xf32>
    %cst_66 = arith.constant 1.000000e+00 : f32
    %130 = vector.broadcast %cst_66 : f32 to vector<8x32xf32>
    %131 = arith.addf %130, %129 : vector<8x32xf32>
    %132 = arith.divf %130, %131 : vector<8x32xf32>
    %133 = arith.addf %102, %120 : vector<8x32xf32>
    %134 = arith.negf %133 : vector<8x32xf32>
    %135 = math.exp %134 : vector<8x32xf32>
    %cst_67 = arith.constant 1.000000e+00 : f32
    %136 = vector.broadcast %cst_67 : f32 to vector<8x32xf32>
    %137 = arith.addf %136, %135 : vector<8x32xf32>
    %138 = arith.divf %136, %137 : vector<8x32xf32>
    %139 = arith.mulf %132, %126 : vector<8x32xf32>
    %140 = arith.addf %108, %139 : vector<8x32xf32>
    %141 = math.tanh %140 : vector<8x32xf32>
    %cst_68 = arith.constant 1.000000e+00 : f32
    %142 = vector.broadcast %cst_68 : f32 to vector<8x32xf32>
    %143 = arith.subf %142, %138 : vector<8x32xf32>
    %144 = arith.mulf %143, %141 : vector<8x32xf32>
    %145 = arith.mulf %138, %90 : vector<8x32xf32>
    %146 = arith.addf %144, %145 : vector<8x32xf32>
    %cst_69 = arith.constant dense<0.000000e+00> : vector<8xf32>
    %147 = vector.multi_reduction <add>, %146, %cst_69 [1] : vector<8x32xf32> to vector<8xf32>
    %148 = vector.shape_cast %147 : vector<8xf32> to vector<8x1xf32>
    %cst_70 = arith.constant 3.200000e+01 : f32
    %149 = vector.broadcast %cst_70 : f32 to vector<8x1xf32>
    %150 = arith.divf %148, %149 : vector<8x1xf32>
    %151 = arith.mulf %146, %146 : vector<8x32xf32>
    %cst_71 = arith.constant dense<0.000000e+00> : vector<8xf32>
    %152 = vector.multi_reduction <add>, %151, %cst_71 [1] : vector<8x32xf32> to vector<8xf32>
    %153 = vector.shape_cast %152 : vector<8xf32> to vector<8x1xf32>
    %cst_72 = arith.constant 3.200000e+01 : f32
    %154 = vector.broadcast %cst_72 : f32 to vector<8x1xf32>
    %155 = arith.divf %153, %154 : vector<8x1xf32>
    %156 = arith.mulf %150, %150 : vector<8x1xf32>
    %157 = arith.subf %155, %156 : vector<8x1xf32>
    %158 = vector.broadcast %150 : vector<8x1xf32> to vector<8x32xf32>
    %159 = arith.subf %146, %158 : vector<8x32xf32>
    %cst_73 = arith.constant 9.99999974E-6 : f32
    %160 = vector.broadcast %cst_73 : f32 to vector<8x1xf32>
    %161 = arith.addf %157, %160 : vector<8x1xf32>
    %162 = math.rsqrt %161 : vector<8x1xf32>
    %163 = vector.broadcast %162 : vector<8x1xf32> to vector<8x32xf32>
    %164 = arith.mulf %159, %163 : vector<8x32xf32>
    %c14 = arith.constant 14 : index
    %c0_74 = arith.constant 0 : index
    %165 = vector.load %arg4[%c14, %c0_74] : memref<18x128xf32, #tpu.memory_space<vmem>>, vector<1x32xf32>
    %166 = vector.broadcast %165 : vector<1x32xf32> to vector<8x32xf32>
    %167 = arith.mulf %164, %166 : vector<8x32xf32>
    %c15 = arith.constant 15 : index
    %c0_75 = arith.constant 0 : index
    %168 = vector.load %arg4[%c15, %c0_75] : memref<18x128xf32, #tpu.memory_space<vmem>>, vector<1x32xf32>
    %169 = vector.broadcast %168 : vector<1x32xf32> to vector<8x32xf32>
    %170 = arith.addf %167, %169 : vector<8x32xf32>
    %c16 = arith.constant 16 : index
    %c0_76 = arith.constant 0 : index
    %171 = vector.load %arg4[%c16, %c0_76] : memref<18x128xf32, #tpu.memory_space<vmem>>, vector<1x32xf32>
    %172 = vector.broadcast %171 : vector<1x32xf32> to vector<8x32xf32>
    %173 = arith.mulf %170, %172 : vector<8x32xf32>
    %cst_77 = arith.constant dense<0.000000e+00> : vector<8xf32>
    %174 = vector.multi_reduction <add>, %173, %cst_77 [1] : vector<8x32xf32> to vector<8xf32>
    %175 = vector.shape_cast %174 : vector<8xf32> to vector<8x1xf32>
    %c17 = arith.constant 17 : index
    %c0_78 = arith.constant 0 : index
    %176 = vector.load %arg4[%c17, %c0_78] : memref<18x128xf32, #tpu.memory_space<vmem>>, vector<1x1xf32>
    %177 = vector.broadcast %176 : vector<1x1xf32> to vector<8x1xf32>
    %178 = arith.addf %175, %177 : vector<8x1xf32>
    %cst_79 = arith.constant 0.000000e+00 : f32
    %179 = vector.broadcast %cst_79 : f32 to vector<8x95xf32>
    %180 = tpu.concatenate %146, %178, %179 in 1 : vector<8x32xf32>, vector<8x1xf32>, vector<8x95xf32> -> vector<8x128xf32>
    %c0_80 = arith.constant 0 : index
    %c0_81 = arith.constant 0 : index
    %181 = vector.load %arg9[%c0_80, %c0_81] : memref<8x128xf32, #tpu.memory_space<vmem>>, vector<8x128xf32>
    tpu.vector_store %arg9[%c0_80, %c0_81], %180 {strides = array<i32>} : memref<8x128xf32, #tpu.memory_space<vmem>>, vector<8x128xf32>,
    return
  }
  func.func @transform_0(%arg0: i32) -> (i32, i32) {
    %c0_i32 = arith.constant 0 : i32
    %c0_i32_0 = arith.constant 0 : i32
    return %arg0, %c0_i32 : i32, i32
  }
  func.func @transform_1(%arg0: i32) -> (i32, i32) {
    %c0_i32 = arith.constant 0 : i32
    %c0_i32_0 = arith.constant 0 : i32
    return %arg0, %c0_i32 : i32, i32
  }
  func.func @transform_2(%arg0: i32) -> (i32, i32) {
    %c0_i32 = arith.constant 0 : i32
    %c0_i32_0 = arith.constant 0 : i32
    return %arg0, %c0_i32 : i32, i32
  }
  func.func @transform_3(%arg0: i32) -> (i32, i32) {
    %c0_i32 = arith.constant 0 : i32
    %c0_i32_0 = arith.constant 0 : i32
    %c0_i32_1 = arith.constant 0 : i32
    return %c0_i32, %c0_i32_0 : i32, i32
  }
  func.func @transform_4(%arg0: i32) -> (i32, i32) {
    %c0_i32 = arith.constant 0 : i32
    %c0_i32_0 = arith.constant 0 : i32
    %c0_i32_1 = arith.constant 0 : i32
    return %c0_i32, %c0_i32_0 : i32, i32
  }
  func.func @transform_5(%arg0: i32) -> (i32, i32) {
    %c0_i32 = arith.constant 0 : i32
    %c0_i32_0 = arith.constant 0 : i32
    %c0_i32_1 = arith.constant 0 : i32
    return %c0_i32, %c0_i32_0 : i32, i32
  }
  func.func @transform_6(%arg0: i32) -> (i32, i32, i32) {
    %c0_i32 = arith.constant 0 : i32
    %c0_i32_0 = arith.constant 0 : i32
    %c0_i32_1 = arith.constant 0 : i32
    %c0_i32_2 = arith.constant 0 : i32
    return %c0_i32, %c0_i32_0, %c0_i32_1 : i32, i32, i32
  }
  func.func @transform_7(%arg0: i32) -> (i32, i32, i32) {
    %c0_i32 = arith.constant 0 : i32
    %c0_i32_0 = arith.constant 0 : i32
    %c0_i32_1 = arith.constant 0 : i32
    %c0_i32_2 = arith.constant 0 : i32
    return %c0_i32, %c0_i32_0, %c0_i32_1 : i32, i32, i32
  }
  func.func @transform_8(%arg0: i32) -> (i32, i32) {
    %c0_i32 = arith.constant 0 : i32
    %c0_i32_0 = arith.constant 0 : i32
    return %arg0, %c0_i32 : i32, i32
  }
}

</mosaic_0001>

<bundles_post_ra>
// kernel: tpu_custom_call.1
= control target key start
LH: loop header
LB: loop body
LE: loop exit
PB: predicated region body
PF: predicated region fallthrough
CT: control target
= control target key end

     0   :  { %13 = vsyncpa [#allocation3], 0  ;;  %s1566_s0 = inlined_call_operand.hbm [shape: f32[8,24], index: 0, kind: input, shape index: {}]   ;;  %s1567_s1 = inlined_call_operand.hbm [shape: f32[8,32], index: 1, kind: input, shape index: {}]   ;;  %s1568_s2 = inlined_call_operand.vmem [shape: f32[8,1], index: 2, kind: input, shape index: {}]   ;;  %s1569_s3 = inlined_call_operand.hbm [shape: f32[18,128], index: 3, kind: input, shape index: {}]   ;;  %s1570_s4 = inlined_call_operand.vmem [shape: f32[24,32], index: 4, kind: input, shape index: {}]   ;;  %s1571_s5 = inlined_call_operand.hbm [shape: f32[32,32], index: 5, kind: input, shape index: {}]   ;;  %s1572_s6 = inlined_call_operand.hbm [shape: f32[3,32,32], index: 6, kind: input, shape index: {}]   ;;  %s1573_s7 = inlined_call_operand.hbm [shape: f32[3,32,32], index: 7, kind: input, shape index: {}]   ;;  %s1574_s8 = inlined_call_operand.hbm [shape: f32[8,128], index: 8, kind: output, shape index: {}]  }
   0x1   :  { %14 = vsyncpa [#allocation6], 0 }
   0x2   :  { %15 = vsyncpa [#allocation9], 0 }
   0x3   :  { %16 = vsyncpa [#allocation12], 0 }
   0x4   :  { %17 = vsyncpa [#allocation4], 0  ;;  %s1343_s27 = smov [#allocation5]   ;;  %s1179_s9 = scalar_lea.hbm %s1567_s1, 128 }
   0x5   :  { %s34_s28 = sshll.u32 %s1343_s27, 4  ;;  %p1180_p0 = scmp.ne.s32.totalorder %s1567_s1, %s1179_s9  ;;  %s35_s28 = int_to_ptr.vmem [resolvable:$true] %s34_s28 }
   0x6   :  { %p1183_p1 = scmp.lt.u32.totalorder %s1179_s9, %s1567_s1 }
   0x8   :  { %p1185_p2 = pnand %p1183_p1, %p1180_p0 }
   0xa   :  { %1188 = shalt.err (!%p1185_p2)
}
   0xb   :  { %s1189_s14 = scalar_lea.vmem %s35_s28, 128  ;;  %p1194_p4 = scmp.lt.s32.totalorder %s35_s28, %s35_s28 }
   0xc   :  { %p1190_p3 = scmp.ne.s32.totalorder %s35_s28, %s1189_s14  ;;  %p1195_p5 = scmp.lt.s32.totalorder %s1189_s14, %s1189_s14 }
   0xe   :  { %p1196_p6 = por %p1195_p5, %p1194_p4 }
  0x10   :  { %p1197_p7 = pnand %p1196_p6, %p1190_p3 }
  0x12   :  { %1200 = shalt.err (!%p1197_p7)
}
  0x13   :  { %37 = dma.hbm_to_vmem [thread:$0]  %s1567_s1, 128, %s35_s28, [#allocation6]  }
  0x14   :  { %s1344_s17 = smov [#allocation8]   ;;  %s1345_s19 = smov [#allocation2]  }
  0x15   :  { %s59_s18 = sshll.u32 %s1344_s17, 4  ;;  %s24_s20 = sshll.u32 %s1345_s19, 4  ;;  %s60_s18 = int_to_ptr.vmem [resolvable:$true] %s59_s18  ;;  %s25_s20 = int_to_ptr.vmem [resolvable:$true] %s24_s20 }
  0x16   :  { %s1201_s23 = scalar_lea.hbm %s1571_s5, 512 }
  0x17   :  { %p1202_p8 = scmp.ne.s32.totalorder %s1571_s5, %s1201_s23  ;;  %p1205_p9 = scmp.lt.u32.totalorder %s1201_s23, %s1571_s5 }
  0x19   :  { %p1207_p10 = pnand %p1205_p9, %p1202_p8 }
  0x1b   :  { %1210 = shalt.err (!%p1207_p10)
}
  0x1c   :  { %s1211_s1 = scalar_lea.vmem %s60_s18, 512  ;;  %p1216_p12 = scmp.lt.s32.totalorder %s60_s18, %s60_s18 }
  0x1d   :  { %p1212_p11 = scmp.ne.s32.totalorder %s60_s18, %s1211_s1  ;;  %p1217_p13 = scmp.lt.s32.totalorder %s1211_s1, %s1211_s1 }
  0x1f   :  { %p1218_p0 = por %p1217_p13, %p1216_p12 }
  0x21   :  { %p1219_p1 = pnand %p1218_p0, %p1212_p11 }
  0x23   :  { %1222 = shalt.err (!%p1219_p1)
}
  0x24   :  { %s1346_s28 = smov 128   ;;  %s1347_s29 = smov 8  }
  0x25   :  { %65 = dma.hbm_to_vmem [thread:$0]  %s1571_s5, 512, %s60_s18, [#allocation9], %s1346_s28, %s1346_s28, %s1347_s29  }
  0x26   :  { %s1223_s12 = scalar_lea.hbm %s1566_s0, 128 }
  0x27   :  { %p1224_p2 = scmp.ne.s32.totalorder %s1566_s0, %s1223_s12  ;;  %p1227_p3 = scmp.lt.u32.totalorder %s1223_s12, %s1566_s0 }
  0x29   :  { %p1229_p4 = pnand %p1227_p3, %p1224_p2 }
  0x2b   :  { %1232 = shalt.err (!%p1229_p4)
}
  0x2c   :  { %s1233_s17 = scalar_lea.vmem %s25_s20, 128  ;;  %p1238_p6 = scmp.lt.s32.totalorder %s25_s20, %s25_s20 }
  0x2d   :  { %p1234_p5 = scmp.ne.s32.totalorder %s25_s20, %s1233_s17  ;;  %p1239_p7 = scmp.lt.s32.totalorder %s1233_s17, %s1233_s17 }
  0x2f   :  { %p1240_p8 = por %p1239_p7, %p1238_p6 }
  0x31   :  { %p1241_p9 = pnand %p1240_p8, %p1234_p5 }
  0x33   :  { %1244 = shalt.err (!%p1241_p9)
}
  0x34   :  { %27 = dma.hbm_to_vmem [thread:$0]  %s1566_s0, 128, %s25_s20, [#allocation3]  }
  0x35   :  { %s1348_s19 = smov [#allocation7]   ;;  %s1349_s22 = smov [#allocation10]  }
  0x36   :  { %s45_s21 = sshll.u32 %s1348_s19, 4  ;;  %s71_s23 = sshll.u32 %s1349_s22, 4  ;;  %s46_s21 = int_to_ptr.vmem [resolvable:$true] %s45_s21  ;;  %s72_s23 = int_to_ptr.vmem [resolvable:$true] %s71_s23 }
  0x37   :  { %s1245_s26 = scalar_lea.hbm %s1569_s3, 384 }
  0x38   :  { %p1246_p10 = scmp.ne.s32.totalorder %s1569_s3, %s1245_s26  ;;  %p1249_p11 = scmp.lt.u32.totalorder %s1245_s26, %s1569_s3 }
  0x3a   :  { %p1251_p12 = pnand %p1249_p11, %p1246_p10 }
  0x3c   :  { %1254 = shalt.err (!%p1251_p12)
}
  0x3d   :  { %s1255_s0 = scalar_lea.vmem %s46_s21, 384  ;;  %p1260_p0 = scmp.lt.s32.totalorder %s46_s21, %s46_s21 }
  0x3e   :  { %p1256_p13 = scmp.ne.s32.totalorder %s46_s21, %s1255_s0  ;;  %p1261_p1 = scmp.lt.s32.totalorder %s1255_s0, %s1255_s0 }
  0x40   :  { %p1262_p2 = por %p1261_p1, %p1260_p0 }
  0x42   :  { %p1263_p3 = pnand %p1262_p2, %p1256_p13 }
  0x44   :  { %1266 = shalt.err (!%p1263_p3)
}
  0x45   :  { %51 = dma.hbm_to_vmem [thread:$0]  %s1569_s3, 384, %s46_s21, [#allocation6], %s1346_s28, %s1346_s28, %s1347_s29  }
  0x46   :  { %s1267_s13 = scalar_lea.hbm %s1572_s6, 1536 }
  0x47   :  { %p1268_p4 = scmp.ne.s32.totalorder %s1572_s6, %s1267_s13  ;;  %p1271_p5 = scmp.lt.u32.totalorder %s1267_s13, %s1572_s6 }
  0x49   :  { %p1273_p6 = pnand %p1271_p5, %p1268_p4 }
  0x4b   :  { %1276 = shalt.err (!%p1273_p6)
}
  0x4c   :  { %s1277_s5 = scalar_lea.vmem %s72_s23, 1536  ;;  %p1282_p8 = scmp.lt.s32.totalorder %s72_s23, %s72_s23 }
  0x4d   :  { %p1278_p7 = scmp.ne.s32.totalorder %s72_s23, %s1277_s5  ;;  %p1283_p9 = scmp.lt.s32.totalorder %s1277_s5, %s1277_s5 }
  0x4f   :  { %p1284_p10 = por %p1283_p9, %p1282_p8 }
  0x51   :  { %p1285_p11 = pnand %p1284_p10, %p1278_p7 }
  0x53   :  { %1288 = shalt.err (!%p1285_p11)
}
  0x54   :  { %77 = dma.hbm_to_vmem [thread:$0]  %s1572_s6, 1536, %s72_s23, [#allocation9], %s1346_s28, %s1346_s28, %s1347_s29  }
  0x55   :  { %s1350_s19 = smov [#allocation11]   ;;  %s1289_s25 = scalar_lea.hbm %s1573_s7, 1536 }
  0x56   :  { %s83_s21 = sshll.u32 %s1350_s19, 4  ;;  %p1290_p12 = scmp.ne.s32.totalorder %s1573_s7, %s1289_s25  ;;  %s84_s21 = int_to_ptr.vmem [resolvable:$true] %s83_s21 }
  0x57   :  { %p1293_p13 = scmp.lt.u32.totalorder %s1289_s25, %s1573_s7 }
  0x59   :  { %p1295_p0 = pnand %p1293_p13, %p1290_p12 }
  0x5b   :  { %1298 = shalt.err (!%p1295_p0)
}
  0x5c   :  { %s1299_s9 = scalar_lea.vmem %s84_s21, 1536  ;;  %p1304_p2 = scmp.lt.s32.totalorder %s84_s21, %s84_s21 }
  0x5d   :  { %p1300_p1 = scmp.ne.s32.totalorder %s84_s21, %s1299_s9  ;;  %p1305_p3 = scmp.lt.s32.totalorder %s1299_s9, %s1299_s9 }
  0x5f   :  { %p1306_p4 = por %p1305_p3, %p1304_p2 }
  0x61   :  { %p1307_p5 = pnand %p1306_p4, %p1300_p1 }
  0x63   :  { %1310 = shalt.err (!%p1307_p5)
}
  0x64   :  { %89 = dma.hbm_to_vmem [thread:$0]  %s1573_s7, 1536, %s84_s21, [#allocation12], %s1346_s28, %s1346_s28, %s1347_s29  }
  0x65   :  { %1333 = dma.done.wait [#allocation3], 128  }
  0x66   :  { %1334 = vsyncadd [#allocation3], 4294967168 }
  0x67   :  { %1335 = dma.done.wait [#allocation6], 512  }
  0x68   :  { %1336 = vsyncadd [#allocation6], 4294966784 }
  0x69   :  { %1337 = dma.done.wait [#allocation9], 2048  }
  0x6a   :  { %1338 = vsyncadd [#allocation9], 4294965248 }
  0x6b   :  { %1339 = dma.done.wait [#allocation12], 1536  }
  0x6c   :  { %1340 = vsyncadd [#allocation12], 4294965760  ;;  %vm109_vm0 = vcmask 195584   ;;  %v108_v0 = vld [vmem:[#allocation2] sm:$0xff]  ;;  %v139_v5 = vld [vmem:[%s1570_s4 + $0x8] sm:$0xff]  ;;  %v1351_v6 = vmov 0.0|0.0  }
  0x6d   :  { %v110_v1 = vsel %vm109_vm0, %v108_v0, 0.0  ;;  %v115_v2 = vmul.f32 %v108_v0, %v108_v0  ;;  %v138_v4 = vld [vmem:[%s1570_s4] sm:$0xff]  ;;  %1093 = vmatprep.subr.bf16.mxu0 %v1351_v6  ;;  %vm1352_vm1 = vmmov 0   ;;  %v1353_v8 = vmov 0.0   ;;  %1096 = vmatprep.subr.bf16.mxu1 %v1351_v6  ;;  %v140_v9 = vld [vmem:[%s1570_s4 + $0x10] sm:$0xff]  ;;  %v249_v32 = vld [vmem:[#allocation8] sm:$0xff] }
  0x6e   :  { %111 = vadd.xlane.f32.xlu0 %v110_v1  ;;  %v1094_v7 = vpack.c.bf16 %v139_v5, %v138_v4  ;;  %1013 = vmatprep.mubr.msk.f32.mxu0 %vm1352_vm1, %v1353_v8  ;;  %v940_v19 = vld [vmem:[#allocation7] ss:$0 sm:$0xff]  ;;  %v941_v21 = vld [vmem:[#allocation7 + $0x1] ss:$0 sm:$0xff]  ;;  %v942_v24 = vld [vmem:[#allocation7 + $0x2] ss:$0 sm:$0xff] }
  0x6f   :  { %v116_v3 = vsel %vm109_vm0, %v115_v2, 0.0  ;;  %1024 = vmatprep.mubr.msk.f32.mxu1 %vm1352_vm1, %v1353_v8  ;;  %vm220_vm2 = vcmask 261120   ;;  %v250_v33 = vld [vmem:[#allocation8 + $0x8] sm:$0xff]  ;;  %v251_v34 = vld [vmem:[#allocation8 + $0x10] sm:$0xff]  ;;  %v252_v36 = vld [vmem:[#allocation8 + $0x18] sm:$0xff]  ;;  %v1354_v52 = vmov 0  }
  0x70   :  { %1095 = vmatpush3.bf16.msra.mxu0 %v1094_v7  ;;  %v1097_v35 = vpack.c.bf16 %v250_v33, %v249_v32  ;;  %v1100_v37 = vpack.c.bf16 %v252_v36, %v251_v34  ;;  %v944_v47 = vld [vmem:[#allocation7 + $0x3] ss:$0 sm:$0xff]  ;;  %v945_v49 = vld [vmem:[#allocation7 + $0x4] ss:$0 sm:$0xff]  ;;  %1160 = vset.pattern.permute.xlu0 %v1354_v52  ;;  %v946_v53 = vld [vmem:[#allocation7 + $0x5] ss:$0 sm:$0xff] }
  0x71   :  { %1011 = vmatprep.subr.mxu0 %v1353_v8  ;;  %v360_v61 = vld [vmem:[%s1568_s2] sm:$0xff]  ;;  %v367_v62 = vld [vmem:[#allocation10] sm:$0xff]  ;;  %v368_v63 = vld [vmem:[#allocation10 + $0x8] sm:$0xff]  ;;  %s1355_s2 = smov 32   ;;  %s1356_s12 = smov [#allocation13]   ;;  %vm919_vm3 = vcmask 269312  }
  0x72   :  { %117 = vadd.xlane.f32.xlu0 %v116_v3  ;;  %1098 = vmatpush3.bf16.msra.mxu1 %v1097_v35  ;;  %v1103_v1 = vpack.c.bf16 %v368_v63, %v367_v62  ;;  %v451_v2 = vld [vmem:[#allocation10 + $0x28] sm:$0xff]  ;;  %v369_v4 = vld [vmem:[#allocation10 + $0x10] sm:$0xff]  ;;  %v370_v5 = vld [vmem:[#allocation10 + $0x18] sm:$0xff]  ;;  %s928_s13 = sshll.u32 %s1356_s12, 4  ;;  %s929_s13 = int_to_ptr.vmem [resolvable:$true] %s928_s13 }
  0x73   :  { %1099 = vmatprep.subr.bf16.mxu1 %v1351_v6  ;;  %v452_v7 = vld [vmem:[#allocation10 + $0x30] sm:$0xff]  ;;  %v533_v33 = vld [vmem:[#allocation10 + $0x58] sm:$0xff]  ;;  %s1311_s14 = scalar_lea.vmem %s929_s13, 128  ;;  %p1316_p7 = scmp.lt.s32.totalorder %s929_s13, %s929_s13 }
  0x74   :  { %1012 = vmatpush3.msra.mxu0 %v140_v9  ;;  %v1106_v9 = vpack.c.bf16 %v370_v5, %v369_v4  ;;  %v694_v34 = vld [vmem:[#allocation11 + $0x30] sm:$0xff]  ;;  %v695_v35 = vld [vmem:[#allocation11 + $0x38] sm:$0xff]  ;;  %p1312_p6 = scmp.ne.s32.totalorder %s929_s13, %s1311_s14  ;;  %p1317_p8 = scmp.lt.s32.totalorder %s1311_s14, %s1311_s14 }
  0x75   :  { %1102 = vmatprep.subr.bf16.mxu0 %v1351_v6 }
  0x76   :  { %1101 = vmatpush3.bf16.msra.mxu1 %v1100_v37  ;;  %v1130_v37 = vpack.c.bf16 %v695_v35, %v694_v34  ;;  %p1318_p9 = por %p1317_p8, %p1316_p7 }
  0x77   :  { %1108 = vmatprep.subr.bf16.mxu1 %v1351_v6 }
  0x78   :  { %p1319_p10 = pnand %p1318_p9, %p1312_p6 }
  0xfb   :  { %v112_v10 = vpop.xlane.xlu0 %111 }
  0xfc   :  { %v114_v11 = vmul.f32 0.041666668, %v112_v10  ;;  %v453_v10 = vld [vmem:[#allocation10 + $0x38] sm:$0xff] }
  0xfe   :  { %v120_v13 = vmul.f32 %v114_v11, %v114_v11  ;;  %v122_v17 = vsub.f32 %v108_v0, %v114_v11  ;;  %v450_v0 = vld [vmem:[#allocation10 + $0x20] sm:$0xff]  ;;  %v1112_v11 = vpack.c.bf16 %v453_v10, %v452_v7  ;;  %v960_v10 = vld [vmem:[#allocation7 + $0xd] ss:$0 sm:$0xff] }
  0xff   :  { %v118_v12 = vpop.xlane.xlu0 %117  ;;  %v1109_v3 = vpack.c.bf16 %v451_v2, %v450_v0 }
 0x100   :  { %v119_v14 = vmul.f32 0.041666668, %v118_v12 }
 0x102   :  { %v121_v15 = vsub.f32 %v119_v14, %v120_v13 }
 0x104   :  { %v123_v16 = vadd.f32 1e-05, %v121_v15 }
 0x106   :  { %1161 = vrsqrt.f32 %v123_v16 }
 0x110   :  { %v1162_v18 = vpop.eup %1161 }
 0x111   :  { %v125_v20 = vmul.f32 %v1162_v18, %v122_v17 }
 0x113   :  { %v131_v22 = vmul.f32 %v940_v19, %v125_v20 }
 0x115   :  { %v137_v23 = vadd.f32 %v941_v21, %v131_v22  ;;  %v948_v21 = vld [vmem:[#allocation7 + $0x6] ss:$0 sm:$0xff]  ;;  %v530_v22 = vld [vmem:[#allocation10 + $0x40] sm:$0xff] }
 0x117   :  { %1014 = vmatmul.mubr.msk.f32.vlgmr.msra.gmra.mrb[0].mxu0 %vm109_vm0, %v137_v23 }
 0x118   :  { %1035 = vmatprep.mubr.msk.f32.mxu0 %vm1352_vm1, %v1353_v8  ;;  %1104 = vmatpush3.bf16.msra.mxu0 %v1103_v1 }
 0x119   :  { %1105 = vmatprep.subr.bf16.mxu0 %v1351_v6 }
 0x11c   :  { %1107 = vmatpush3.bf16.msra.mxu0 %v1106_v9 }
 0x11d   :  { %1114 = vmatprep.subr.bf16.mxu0 %v1351_v6 }
 0x1ea   :  { %v215_v25 = vpop.f32.mrb[0].mxu0 }
 0x1eb   :  { %v216_v26 = vadd.f32 %v942_v24, %v215_v25  ;;  %v1015_v27 = vpop.f32.mrb[1].mxu0  ;;  %v531_v24 = vld [vmem:[#allocation10 + $0x48] sm:$0xff]  ;;  %v692_v25 = vld [vmem:[#allocation11 + $0x20] sm:$0xff] }
 0x1ec   :  { %v949_v27 = vld [vmem:[#allocation7 + $0x7] ss:$0 sm:$0xff] }
 0x1ed   :  { %v219_v28 = vmax.f32 %v216_v26, 0.0  ;;  %v693_v26 = vld [vmem:[#allocation11 + $0x28] sm:$0xff] }
 0x1ef   :  { %v221_v29 = vsel %vm220_vm2, %v219_v28, 0.0  ;;  %v226_v30 = vmul.f32 %v219_v28, %v219_v28 }
 0x1f0   :  { %222 = vadd.xlane.f32.xlu1 %v221_v29  ;;  %v1115_v29 = vpack.c.bf16 %v531_v24, %v530_v22 }
 0x1f1   :  { %v227_v31 = vsel %vm220_vm2, %v226_v30, 0.0  ;;  %v1127_v30 = vpack.c.bf16 %v693_v26, %v692_v25 }
 0x1f4   :  { %228 = vadd.xlane.f32.xlu1 %v227_v31  ;;  %v532_v31 = vld [vmem:[#allocation10 + $0x50] sm:$0xff] }
 0x1f5   :  { %v1118_v36 = vpack.c.bf16 %v533_v33, %v532_v31 }
 0x27d   :  { %v223_v38 = vpop.xlane.xlu1 %222 }
 0x27e   :  { %v225_v39 = vmul.f32 0.03125, %v223_v38  ;;  %v359_v38 = vld [vmem:[#allocation5] sm:$0xff] }
 0x280   :  { %v231_v41 = vmul.f32 %v225_v39, %v225_v39  ;;  %v233_v45 = vsub.f32 %v219_v28, %v225_v39 }
 0x281   :  { %v229_v40 = vpop.xlane.xlu1 %228 }
 0x282   :  { %v230_v42 = vmul.f32 0.03125, %v229_v40  ;;  %v609_v40 = vld [vmem:[#allocation11] sm:$0xff] }
 0x284   :  { %v232_v43 = vsub.f32 %v230_v42, %v231_v41  ;;  %v610_v41 = vld [vmem:[#allocation11 + $0x8] sm:$0xff]  ;;  %v772_v42 = vld [vmem:[#allocation11 + $0x40] sm:$0xff] }
 0x286   :  { %v234_v44 = vadd.f32 1e-05, %v232_v43  ;;  %v773_v43 = vld [vmem:[#allocation11 + $0x48] sm:$0xff] }
 0x288   :  { %1163 = vrsqrt.f32 %v234_v44 }
 0x292   :  { %v1164_v46 = vpop.eup %1163 }
 0x293   :  { %v236_v48 = vmul.f32 %v1164_v46, %v233_v45  ;;  %v1121_v45 = vpack.c.bf16 %v610_v41, %v609_v40  ;;  %v1133_v46 = vpack.c.bf16 %v773_v43, %v772_v42  ;;  %v966_v40 = vld [vmem:[#allocation7 + $0x10] ss:$0 sm:$0xff] }
 0x295   :  { %v242_v50 = vmul.f32 %v944_v47, %v236_v48  ;;  %v611_v47 = vld [vmem:[#allocation11 + $0x10] sm:$0xff]  ;;  %v612_v48 = vld [vmem:[#allocation11 + $0x18] sm:$0xff] }
 0x297   :  { %v248_v51 = vadd.f32 %v945_v49, %v242_v50  ;;  %v774_v49 = vld [vmem:[#allocation11 + $0x50] sm:$0xff]  ;;  %v775_v50 = vld [vmem:[#allocation11 + $0x58] sm:$0xff] }
 0x298   :  { %v1136_v52 = vpack.c.bf16 %v775_v50, %v774_v49 }
 0x299   :  { %1025 = vmatmul.mubr.msk.f32.vlgmr.msra.gmra.mrb[0].mxu1 %vm220_vm2, %v248_v51  ;;  %v1124_v51 = vpack.c.bf16 %v612_v48, %v611_v47 }
 0x29a   :  { %1046 = vmatprep.mubr.msk.f32.mxu1 %vm1352_vm1, %v1353_v8  ;;  %1110 = vmatpush3.bf16.msra.mxu1 %v1109_v3 }
 0x29b   :  { %1111 = vmatprep.subr.bf16.mxu1 %v1351_v6 }
 0x29e   :  { %1113 = vmatpush3.bf16.msra.mxu1 %v1112_v11 }
 0x29f   :  { %1126 = vmatprep.subr.bf16.mxu1 %v1351_v6 }
 0x36c   :  { %v327_v54 = vpop.f32.mrb[0].mxu1 }
 0x36d   :  { %v328_v55 = vadd.f32 %v946_v53, %v327_v54  ;;  %v1026_v56 = vpop.f32.mrb[1].mxu1 }
 0x36f   :  { %v331_v57 = vmax.f32 %v328_v55, 0.0 }
 0x371   :  { %v332_v58 = vsel %vm220_vm2, %v331_v57, 0.0  ;;  %v336_v59 = vmul.f32 %v331_v57, %v331_v57 }
 0x372   :  { %333 = vadd.xlane.f32.xlu0 %v332_v58  ;;  %v952_v58 = vld [vmem:[#allocation7 + $0x9] ss:$0 sm:$0xff] }
 0x373   :  { %v337_v60 = vsel %vm220_vm2, %v336_v59, 0.0  ;;  %v958_v59 = vld [vmem:[#allocation7 + $0xc] ss:$0 sm:$0xff] }
 0x374   :  { %338 = vadd.xlane.f32.xlu1 %v337_v60 }
 0x388   :  { %363 = vperm.xlu0 %1160, %v360_v61   ;;  %v1140_v61 = vadd.f32 %v958_v59, %v952_v58 }
 0x3ff   :  { %v334_v12 = vpop.xlane.xlu0 %333 }
 0x400   :  { %v335_v13 = vmul.f32 0.03125, %v334_v12  ;;  %v954_v12 = vld [vmem:[#allocation7 + $0xa] ss:$0 sm:$0xff] }
 0x401   :  { %v339_v14 = vpop.xlane.xlu1 %338 }
 0x402   :  { %v341_v15 = vmul.f32 %v335_v13, %v335_v13  ;;  %v340_v16 = vmul.f32 0.03125, %v339_v14  ;;  %v343_v19 = vsub.f32 %v331_v57, %v335_v13  ;;  %v950_v57 = vld [vmem:[#allocation7 + $0x8] ss:$0 sm:$0xff] }
 0x404   :  { %v342_v17 = vsub.f32 %v340_v16, %v341_v15 }
 0x406   :  { %v344_v18 = vadd.f32 1e-05, %v342_v17 }
 0x407   :  { %v364_v39 = vpop.permute.xlu0 %363 }
 0x408   :  { %1165 = vrsqrt.f32 %v344_v18  ;;  %v1532_v44 = vmul.f32 %v364_v39, %v359_v38  ;;  %v965_v38 = vld [vmem:[#allocation7 + $0xf] ss:$0 sm:$0xff] }
 0x412   :  { %v1166_v20 = vpop.eup %1165 }
 0x413   :  { %v346_v23 = vmul.f32 %v1166_v20, %v343_v19 }
 0x415   :  { %v352_v28 = vmul.f32 %v948_v21, %v346_v23 }
 0x417   :  { %v358_v32 = vadd.f32 %v949_v27, %v352_v28 }
 0x419   :  { %1036 = vmatmul.mubr.msk.f32.vlgmr.msra.gmra.mrb[2].mxu0 %vm220_vm2, %v358_v32  ;;  %1047 = vmatmul.mubr.msk.f32.vlgmr.msra.gmra.mrb[2].mxu1 %vm220_vm2, %v358_v32 }
 0x41a   :  { %1116 = vmatpush3.bf16.msra.mxu0 %v1115_v29  ;;  %1128 = vmatpush3.bf16.msra.mxu1 %v1127_v30 }
 0x41b   :  { %1117 = vmatprep.subr.bf16.mxu0 %v1351_v6  ;;  %1129 = vmatprep.subr.bf16.mxu1 %v1351_v6 }
 0x41c   :  { %1057 = vmatprep.mubr.msk.f32.mxu0 %vm1352_vm1, %v1353_v8  ;;  %1079 = vmatprep.mubr.msk.f32.mxu1 %vm1352_vm1, %v1353_v8 }
 0x41e   :  { %1119 = vmatpush3.bf16.msra.mxu0 %v1118_v36  ;;  %1131 = vmatpush3.bf16.msra.mxu1 %v1130_v37  ;;  %v964_v36 = vld [vmem:[#allocation7 + $0xe] ss:$0 sm:$0xff] }
 0x41f   :  { %1120 = vmatprep.subr.bf16.mxu0 %v1351_v6  ;;  %1132 = vmatprep.subr.bf16.mxu1 %v1351_v6 }
 0x421   :  { %1058 = vmatmul.mubr.msk.f32.vlgmr.msra.gmra.mrb[4].mxu0 %vm220_vm2, %v358_v32  ;;  %1080 = vmatmul.mubr.msk.f32.vlgmr.msra.gmra.mrb[2].mxu1 %vm220_vm2, %v1532_v44 }
 0x422   :  { %1122 = vmatpush3.bf16.msra.mxu0 %v1121_v45  ;;  %1134 = vmatpush3.bf16.msra.mxu1 %v1133_v46 }
 0x423   :  { %1123 = vmatprep.subr.bf16.mxu0 %v1351_v6  ;;  %1135 = vmatprep.subr.bf16.mxu1 %v1351_v6  ;;  %v956_v6 = vld [vmem:[#allocation7 + $0xb] ss:$0 sm:$0xff] }
 0x424   :  { %1068 = vmatprep.mubr.msk.f32.mxu0 %vm1352_vm1, %v1353_v8  ;;  %1090 = vmatprep.mubr.msk.f32.mxu1 %vm1352_vm1, %v1353_v8  ;;  %v1138_v60 = vadd.f32 %v956_v6, %v950_v57 }
 0x426   :  { %1125 = vmatpush3.bf16.msra.mxu0 %v1124_v51  ;;  %1137 = vmatpush3.bf16.msra.mxu1 %v1136_v52 }
 0x429   :  { %1069 = vmatmul.mubr.msk.f32.vlgmr.msra.gmra.mrb[2].mxu0 %vm220_vm2, %v1532_v44  ;;  %1091 = vmatmul.mubr.msk.f32.vlgmr.msra.gmra.mrb[4].mxu1 %vm220_vm2, %v1532_v44 }
 0x4f4   :  { %v605_v53 = vpop.f32.mrb[4].mxu0  ;;  %v767_v54 = vpop.f32.mrb[2].mxu1 }
 0x4f5   :  { %v1059_v55 = vpop.f32.mrb[5].mxu0  ;;  %v1081_v56 = vpop.f32.mrb[3].mxu1  ;;  %v1141_v3 = vadd.f32 %v1140_v61, %v767_v54  ;;  %v606_v15 = vadd.f32 %v954_v12, %v605_v53 }
 0x4f7   :  { %v963_v4 = vmul.f32 -1.442695, %v1141_v3 }
 0x4fc   :  { %v687_v62 = vpop.f32.mrb[2].mxu0  ;;  %v847_v8 = vpop.f32.mrb[4].mxu1 }
 0x4fd   :  { %v1139_v63 = vadd.f32 %v1138_v60, %v687_v62  ;;  %v1070_v0 = vpop.f32.mrb[3].mxu0  ;;  %v1092_v1 = vpop.f32.mrb[5].mxu1  ;;  %v848_v13 = vadd.f32 %v960_v10, %v847_v8 }
 0x4ff   :  { %v962_v2 = vmul.f32 -1.442695, %v1139_v63 }
 0x501   :  { %1167 = vpow2.f32 %v962_v2 }
 0x502   :  { %1169 = vpow2.f32 %v963_v4 }
 0x50b   :  { %v1168_v5 = vpop.eup %1167 }
 0x50c   :  { %v855_v7 = vadd.f32 1.0, %v1168_v5  ;;  %v1170_v9 = vpop.eup %1169 }
 0x50d   :  { %v862_v11 = vadd.f32 1.0, %v1170_v9 }
 0x50e   :  { %1171 = vrcp.f32 %v855_v7 }
 0x50f   :  { %1173 = vrcp.f32 %v862_v11 }
 0x518   :  { %v1172_v14 = vpop.eup %1171 }
 0x519   :  { %v865_v16 = vmul.f32 %v1172_v14, %v848_v13  ;;  %v1174_v18 = vpop.eup %1173 }
 0x51a   :  { %v868_v19 = vsub.f32 1.0, %v1174_v18  ;;  %v870_v22 = vmul.f32 %v1174_v18, %v1532_v44  ;;  %v967_v44 = vld [vmem:[#allocation7 + $0x11] ss:$0 sm:$0xff] }
 0x51b   :  { %v866_v17 = vadd.f32 %v865_v16, %v606_v15 }
 0x51d   :  { %1175 = vtanh.f32 %v866_v17 }
 0x527   :  { %v1176_v20 = vpop.eup %1175 }
 0x528   :  { %v869_v21 = vmul.f32 %v1176_v20, %v868_v19 }
 0x52a   :  { %v871_v23 = vadd.f32 %v870_v22, %v869_v21 }
 0x52c   :  { %v872_v24 = vsel %vm220_vm2, %v871_v23, 0.0  ;;  %v876_v25 = vmul.f32 %v871_v23, %v871_v23 }
 0x52d   :  { %873 = vadd.xlane.f32.xlu1 %v872_v24 }
 0x52e   :  { %v877_v26 = vsel %vm220_vm2, %v876_v25, 0.0 }
 0x531   :  { %878 = vadd.xlane.f32.xlu1 %v877_v26 }
 0x5ba   :  { %v874_v27 = vpop.xlane.xlu1 %873 }
 0x5bb   :  { %v875_v28 = vmul.f32 0.03125, %v874_v27 }
 0x5bd   :  { %v881_v30 = vmul.f32 %v875_v28, %v875_v28  ;;  %v883_v34 = vsub.f32 %v871_v23, %v875_v28 }
 0x5be   :  { %v879_v29 = vpop.xlane.xlu1 %878 }
 0x5bf   :  { %v880_v31 = vmul.f32 0.03125, %v879_v29 }
 0x5c1   :  { %v882_v32 = vsub.f32 %v880_v31, %v881_v30 }
 0x5c3   :  { %v884_v33 = vadd.f32 1e-05, %v882_v32 }
 0x5c5   :  { %1177 = vrsqrt.f32 %v884_v33 }
 0x5cf   :  { %v1178_v35 = vpop.eup %1177 }
 0x5d0   :  { %v886_v37 = vmul.f32 %v1178_v35, %v883_v34 }
 0x5d2   :  { %v892_v39 = vmul.f32 %v964_v36, %v886_v37 }
 0x5d4   :  { %v898_v41 = vadd.f32 %v965_v38, %v892_v39 }
 0x5d6   :  { %v904_v42 = vmul.f32 %v966_v40, %v898_v41 }
 0x5d8   :  { %v905_v43 = vsel %vm220_vm2, %v904_v42, 0.0 }
 0x5d9   :  { %906 = vadd.xlane.f32.xlu1 %v905_v43 }
 0x666   :  { %v907_v45 = vpop.xlane.xlu1 %906 }
 0x667   :  { %v913_v46 = vadd.f32 %v967_v44, %v907_v45 }
 0x669   :  { %915 = vrot.lane.b32.xlu1 %v913_v46, %s1355_s2 }
 0x6db   :  { %v916_v47 = vpop.permute.xlu1 %915 }
 0x6dc   :  { %v918_v48 = vsel %vm220_vm2, %v871_v23, %v916_v47 }
 0x6dd   :  { %v920_v49 = vsel %vm919_vm3, %v918_v48, 0.0 }
 0x6de   :  { %921 = vst [vmem:[#allocation13] sm:$0xff] %v920_v49 }
 0x6df   :  { %1322 = shalt.err (!%p1319_p10)
}
 0x6e0   :  { %s1323_s17 = scalar_lea.hbm %s1574_s8, 128 }
 0x6e1   :  { %p1324_p11 = scmp.ne.s32.totalorder %s1574_s8, %s1323_s17  ;;  %p1327_p12 = scmp.lt.u32.totalorder %s1323_s17, %s1574_s8 }
 0x6e3   :  { %p1329_p13 = pnand %p1327_p12, %p1324_p11 }
 0x6e5   :  { %1332 = shalt.err (!%p1329_p13)
}
 0x6e6   :  { %931 = dma.vmem_to_hbm [thread:$0]  %s929_s13, 128, %s1574_s8, [#allocation4]  }
 0x6e7   :  { %1341 = dma.done.wait [#allocation4], 128  }
 0x6e8   :  { %1342 = vsyncadd [#allocation4], 4294967168 }
 0x6e9   :  { %935 = vsyncpa [#allocation3], 1 }
 0x6ea   :  { %936 = vsyncpa [#allocation6], 1 }
 0x6eb   :  { %937 = vsyncpa [#allocation9], 1 }
 0x6ec   :  { %938 = vsyncpa [#allocation12], 1 }
 0x6ed   :  { %939 = vsyncpa [#allocation4], 1 }

</bundles_post_ra>
